<compile_context>
chip_gen: v7x
topology: tpu7x:2x2x1
jax: 0.10.0
libtpu: 0.0.40
codegen_flags: <defaults>
</compile_context>

<pallas_src>
import functools

import jax
import jax.numpy as jnp
from jax.experimental import pallas as pl
from jax.experimental.pallas import tpu as pltpu


def _round_up(x, m):
    return (x + m - 1) // m * m


def _pick_tile_m(m, tm_target):
    """Pick the M-tile: large, multiple of 16, prefer exact divisors, >=2 steps when big."""
    tm_target = max(16, _round_up(tm_target, 16))
    if m <= tm_target:
        if m >= 1024:
            # Enough work to split across two TensorCores (v7x) / hide pipeline ramp.
            return _round_up(pl.cdiv(m, 2), 16)
        return _round_up(m, 16)
    # Prefer a large tile that divides M exactly (no padded rows); else pad the tail.
    for t in range(tm_target, max(tm_target // 4, 128) - 1, -16):
        if m % t == 0:
            return t
    return tm_target


def _patch_embed_kernel(p_ref, w_ref, b_ref, o_ref):
    # p_ref: (TM, K)      patch-row tile (mm_dtype), pipelined over the grid
    # w_ref: (K, E_pad)   flattened conv weight, resident across grid steps
    # b_ref: (1, E_pad)   bias (f32), resident
    # o_ref: (TM, E_pad)  lane-dense output tile
    acc = jnp.dot(p_ref[...], w_ref[...], preferred_element_type=jnp.float32)
    o_ref[...] = (acc + b_ref[...]).astype(o_ref.dtype)


def image_patch_embedding(x, weight, bias, patch_size, *,
                          out_dtype=None, mm_dtype=jnp.bfloat16, tm_target=1024):
    """Conv2d(stride=kernel=P, pad=0) -> flatten(-2,-1) -> permute(0,2,1).

    x: (B, C, H, W); weight: (E, C, P, P); bias: (E,).  Returns (B, N, E).
    mm_dtype: MXU operand dtype (bf16 default; pass jnp.float32 for tighter parity).
    out_dtype: output dtype (None -> x.dtype; pass bf16 to halve output HBM traffic).
    """
    B, C, H, W = x.shape
    E = weight.shape[0]
    P = patch_size
    assert H % P == 0 and W % P == 0, "H, W must be multiples of patch_size"
    Hn, Wn = H // P, W // P
    N = Hn * Wn
    K = C * P * P
    M = B * N
    out_dtype = x.dtype if out_dtype is None else out_dtype

    # ---- patch matrix (single XLA fusion: read x, cast, write bf16 patches) ----
    # Cast first so the cast fuses with the transpose (no-op if x is already bf16).
    xq = x.astype(mm_dtype)
    # (B, C, Hn, P, Wn, P) -> (B, Hn, Wn, C, P, P) -> (M, K); row n = hi*Wn + wi,
    # column order (c, ph, pw) matches weight.reshape(E, C*P*P).
    patches = xq.reshape(B, C, Hn, P, Wn, P).transpose(0, 2, 4, 1, 3, 5).reshape(M, K)

    # ---- flattened conv weight / bias, lane-dense E ----
    w2d = jnp.transpose(weight.reshape(E, K)).astype(mm_dtype)      # (K, E)
    b2d = bias.reshape(1, E).astype(jnp.float32)
    E_pad = _round_up(E, 128)
    if E_pad != E:
        w2d = jnp.pad(w2d, ((0, 0), (0, E_pad - E)))
        b2d = jnp.pad(b2d, ((0, 0), (0, E_pad - E)))
    # NOTE: K is left unpadded here.  With wrapper-side patch extraction a K pad
    # would force an extra HBM copy of the patch matrix, which outweighs the few-%
    # MXU/lane-alignment gain (K is already 128-aligned for P in {8, 16}).

    # ---- M tiling ----
    TM = _pick_tile_m(M, tm_target)
    M_pad = _round_up(M, TM)
    if M_pad != M:
        patches = jnp.pad(patches, ((0, M_pad - M), (0, 0)))
    grid = (M_pad // TM,)

    # ---- VMEM budget: size from the actual working set (v7x: 64 MiB/TC) ----
    mm_bytes = jnp.dtype(mm_dtype).itemsize
    out_bytes = jnp.dtype(out_dtype).itemsize
    vmem_est = (2 * TM * K * mm_bytes          # double-buffered patch tiles
                + 2 * TM * E_pad * out_bytes   # double-buffered output tiles
                + 2 * K * E_pad * mm_bytes     # resident weight (conservative x2)
                + 2 * E_pad * 4)               # resident bias
    vmem_limit = max(16 << 20, min(int(1.5 * vmem_est) + (4 << 20), 96 << 20))

    cost = pl.CostEstimate(
        flops=2 * M_pad * K * E_pad,
        transcendentals=0,
        bytes_accessed=(M_pad * K * mm_bytes + K * E_pad * mm_bytes
                        + M_pad * E_pad * out_bytes),
    )

    out = pl.pallas_call(
        _patch_embed_kernel,
        out_shape=jax.ShapeDtypeStruct((M_pad, E_pad), out_dtype),
        grid=grid,
        in_specs=[
            pl.BlockSpec((TM, K), lambda i: (i, 0)),      # patch tile, pipelined
            pl.BlockSpec((K, E_pad), lambda i: (0, 0)),   # weight: fetched once, resident
            pl.BlockSpec((1, E_pad), lambda i: (0, 0)),   # bias: fetched once, resident
        ],
        out_specs=pl.BlockSpec((TM, E_pad), lambda i: (i, 0)),
        compiler_params=pltpu.CompilerParams(
            dimension_semantics=("parallel",),            # rows independent -> megacore
            allow_input_fusion=[True, False, False],      # let XLA fold patch producer
            vmem_limit_bytes=vmem_limit,
        ),
        cost_estimate=cost,
    )(patches, w2d, b2d)

    return out[:M, :E].reshape(B, N, E)


if __name__ == "__main__":
    # Small shapes consistent with the module: B=2, in_channels=3, H=W=16,
    # patch_size=8 -> N = (16/8)^2 = 4 patches, embed_dim=32.
    B, C, H, W = 2, 3, 16, 16
    P, E = 8, 32

    key = jax.random.PRNGKey(0)
    kx, kw, kb = jax.random.split(key, 3)
    x = jax.random.normal(kx, (B, C, H, W), dtype=jnp.float32)
    weight = jax.random.normal(kw, (E, C, P, P), dtype=jnp.float32) * 0.02
    bias = jax.random.normal(kb, (E,), dtype=jnp.float32) * 0.02

    # bf16 output exercises the reduced-output-traffic path recommended by the review.
    fn = jax.jit(functools.partial(image_patch_embedding, patch_size=P,
                                   out_dtype=jnp.bfloat16))
    out = jax.block_until_ready(fn(x, weight, bias))

    # reference: conv2d(stride=kernel=P) -> flatten(-2,-1) -> permute(0,2,1)
    conv = jax.lax.conv_general_dilated(
        x, weight, window_strides=(P, P), padding="VALID",
        dimension_numbers=("NCHW", "OIHW", "NCHW"),
    ) + bias.reshape(1, E, 1, 1)
    ref = conv.reshape(B, E, -1).transpose(0, 2, 1)

    N = (H // P) * (W // P)
    assert out.shape == (B, N, E), out.shape
    assert out.dtype == jnp.bfloat16, out.dtype
    # bf16 MXU operands + bf16 store, f32 accumulation -> loose tolerance vs f32 conv.
    assert jnp.allclose(out.astype(jnp.float32), ref, atol=2e-2, rtol=2e-2), \
        "mismatch vs conv reference"
    print("KERNEL_OK")
</pallas_src>

<mosaic_0001>
module attributes {stable_mosaic.version = 11 : i64} {
  func.func @_patch_embed_kernel(%arg0: i32, %arg1: memref<16x192xbf16, #tpu.memory_space<vmem>>, %arg2: memref<192x128xbf16, #tpu.memory_space<vmem>>, %arg3: memref<1x128xf32, #tpu.memory_space<vmem>>, %arg4: memref<16x128xbf16, #tpu.memory_space<vmem>>) attributes {dimension_semantics = [#tpu.dimension_semantics<parallel>], iteration_bounds = array<i64: 1>, scalar_prefetch = 0 : i64, scratch_operands = 0 : i64, tpu.core_type = #tpu.core_type<tc>, window_params = [{transform_indices = @transform_0, window_bounds = array<i64: 16, 192>}, {pipeline_mode = #tpu.pipeline_mode<synchronous>, transform_indices = @transform_1, window_bounds = array<i64: 192, 128>}, {pipeline_mode = #tpu.pipeline_mode<synchronous>, transform_indices = @transform_2, window_bounds = array<i64: 1, 128>}, {transform_indices = @transform_3, window_bounds = array<i64: 16, 128>}]} {
    %c0 = arith.constant 0 : index
    %c0_0 = arith.constant 0 : index
    %0 = vector.load %arg1[%c0, %c0_0] : memref<16x192xbf16, #tpu.memory_space<vmem>>, vector<16x192xbf16>
    %c0_1 = arith.constant 0 : index
    %c0_2 = arith.constant 0 : index
    %1 = vector.load %arg2[%c0_1, %c0_2] : memref<192x128xbf16, #tpu.memory_space<vmem>>, vector<192x128xbf16>
    %cst = arith.constant dense<0.000000e+00> : vector<16x128xf32>
    %2 = tpu.matmul %0, %1, %cst {dimension_numbers = #tpu.dot_dimension_numbers<[1], [0], [0], [1], [0, 0, 1, 1], [], []>} : vector<16x192xbf16>, vector<192x128xbf16>, vector<16x128xf32> -> vector<16x128xf32>
    %c0_3 = arith.constant 0 : index
    %c0_4 = arith.constant 0 : index
    %3 = vector.load %arg3[%c0_3, %c0_4] : memref<1x128xf32, #tpu.memory_space<vmem>>, vector<1x128xf32>
    %4 = vector.broadcast %3 : vector<1x128xf32> to vector<16x128xf32>
    %5 = arith.addf %2, %4 : vector<16x128xf32>
    %6 = arith.truncf %5 : vector<16x128xf32> to vector<16x128xbf16>
    %c0_5 = arith.constant 0 : index
    %c0_6 = arith.constant 0 : index
    %7 = vector.load %arg4[%c0_5, %c0_6] : memref<16x128xbf16, #tpu.memory_space<vmem>>, vector<16x128xbf16>
    tpu.vector_store %arg4[%c0_5, %c0_6], %6 {strides = array<i32>} : memref<16x128xbf16, #tpu.memory_space<vmem>>, vector<16x128xbf16>,
    return
  }
  func.func @transform_0(%arg0: i32) -> (i32, i32) {
    %c0_i32 = arith.constant 0 : i32
    %c0_i32_0 = arith.constant 0 : i32
    return %arg0, %c0_i32 : i32, i32
  }
  func.func @transform_1(%arg0: i32) -> (i32, i32) {
    %c0_i32 = arith.constant 0 : i32
    %c0_i32_0 = arith.constant 0 : i32
    %c0_i32_1 = arith.constant 0 : i32
    return %c0_i32, %c0_i32_0 : i32, i32
  }
  func.func @transform_2(%arg0: i32) -> (i32, i32) {
    %c0_i32 = arith.constant 0 : i32
    %c0_i32_0 = arith.constant 0 : i32
    %c0_i32_1 = arith.constant 0 : i32
    return %c0_i32, %c0_i32_0 : i32, i32
  }
  func.func @transform_3(%arg0: i32) -> (i32, i32) {
    %c0_i32 = arith.constant 0 : i32
    %c0_i32_0 = arith.constant 0 : i32
    return %arg0, %c0_i32 : i32, i32
  }
}

</mosaic_0001>

<bundles_post_ra>
// kernel: image_patch_embedding.2
= control target key start
LH: loop header
LB: loop body
LE: loop exit
PB: predicated region body
PF: predicated region fallthrough
CT: control target
= control target key end

     0   :  { %s367_s0 = inlined_call_operand.vmem [shape: bf16[192,128], index: 0, kind: input, shape index: {}]   ;;  %s368_s1 = inlined_call_operand.vmem [shape: f32[1,128], index: 1, kind: input, shape index: {}]   ;;  %s369_s2 = inlined_call_operand.vmem [shape: bf16[8,192], index: 2, kind: input, shape index: {}]   ;;  %s370_s3 = inlined_call_operand.<no memory space> [shape: bf16[], index: 3, kind: input, shape index: {}]   ;;  %s371_s4 = inlined_call_operand.vmem [shape: bf16[16,128], index: 4, kind: output, shape index: {}]  }
   0x1   :  { %v9_v0 = vstv %s370_s3 }
   0x2   :  { %v10_v1 = vunpack.i.l.bf16 %v9_v0 }
   0x3   :  { %v277_v2 = vld [vmem:[%s367_s0] sm:$0xff]   ;;  %v53_v3 = vlaneseq  ;;  %v289_v5 = vmov 0   ;;  %v278_v6 = vld [vmem:[%s367_s0 + $0x8] sm:$0xff]   ;;  %v279_v8 = vld [vmem:[%s367_s0 + $0x10] sm:$0xff]   ;;  %v290_v16 = vmov 0.0   ;;  %vm185_vm1 = vcmask 523264  }
   0x4   :  { %v268_v4 = vpack.c.bf16 %v10_v1, %v10_v1  ;;  %189 = vmatprep.subr.bf16.mxu0 %v289_v5  ;;  %v280_v10 = vld [vmem:[%s367_s0 + $0x18] sm:$0xff]   ;;  %v29_v11 = vld [vmem:[%s369_s2] sm:$0xf]  ;;  %v244_v12 = vld [vmem:[%s369_s2 + $0x4] sm:$0xf] }
   0x5   :  { %190 = vmatpush1.bf16.msra.mxu0 %v277_v2  ;;  %v54_v7 = vand.u32 127, %v53_v3  ;;  %39 = vst [vmem:[#allocation7] sm:$0xf] %v29_v11  ;;  %v51_v13 = vunpack.c.l.bf16 %v244_v12  ;;  %v281_v14 = vld [vmem:[%s367_s0 + $0x20] sm:$0xff]   ;;  %v282_v18 = vld [vmem:[%s367_s0 + $0x28] sm:$0xff]   ;;  %v283_v19 = vld [vmem:[%s367_s0 + $0x30] sm:$0xff]  }
   0x6   :  { %191 = vmatprep.subr.bf16.mxu0 %v289_v5  ;;  %v284_v21 = vld [vmem:[%s367_s0 + $0x38] sm:$0xff]   ;;  %v285_v23 = vld [vmem:[%s367_s0 + $0x40] sm:$0xff]   ;;  %v286_v24 = vld [vmem:[%s367_s0 + $0x48] sm:$0xff]  }
   0x7   :  { %v55_v9 = vadd.s32 128, %v54_v7  ;;  %v287_v25 = vld [vmem:[%s367_s0 + $0x50] sm:$0xff]   ;;  %v288_v26 = vld [vmem:[%s367_s0 + $0x58] sm:$0xff]   ;;  %v245_v28 = vld [vmem:[%s368_s1] ss:$0 sm:$0xff] }
   0x9   :  { %192 = vmatpush1.bf16.msra.mxu0 %v278_v6  ;;  %vm56_vm0 = vcmp.lt.s32.totalorder %v55_v9, 192 }
   0xa   :  { %193 = vmatprep.subr.bf16.mxu0 %v289_v5  ;;  %v57_v15 = vsel %vm56_vm0, %v51_v13, %v10_v1 }
   0xb   :  { %v59_v17 = vpack.c.bf16 %v290_v16, %v57_v15 }
   0xd   :  { %194 = vmatpush1.bf16.msra.mxu0 %v279_v8  ;;  %61 = vst [vmem:[#allocation7 + $0x4] sm:$0xf] %v59_v17 }
   0xe   :  { %195 = vmatprep.subr.bf16.mxu0 %v289_v5 }
  0x11   :  { %196 = vmatpush1.bf16.msra.mxu0 %v280_v10 }
  0x12   :  { %197 = vmatprep.subr.bf16.mxu0 %v289_v5 }
  0x14   :  { %v71_v20 = vld [vmem:[#allocation7] sm:$0xff] }
  0x15   :  { %198 = vmatpush1.bf16.msra.mxu0 %v281_v14  ;;  %v247_v22 = vcombine.high %v71_v20, %v268_v4  ;;  %v246_v27 = vcombine.low %v71_v20, %v268_v4 }
  0x16   :  { %199 = vmatprep.subr.bf16.mxu0 %v289_v5 }
  0x17   :  { %260 = vmatprep.mubr.msk.bf16.mxu0 %vm185_vm1, %v247_v22 }
  0x19   :  { %200 = vmatpush1.bf16.msra.mxu0 %v282_v18 }
  0x1a   :  { %201 = vmatprep.subr.bf16.mxu0 %v289_v5 }
  0x1d   :  { %202 = vmatpush1.bf16.msra.mxu0 %v283_v19 }
  0x1e   :  { %203 = vmatprep.subr.bf16.mxu0 %v289_v5 }
  0x21   :  { %204 = vmatpush1.bf16.msra.mxu0 %v284_v21 }
  0x22   :  { %205 = vmatprep.subr.bf16.mxu0 %v289_v5 }
  0x25   :  { %206 = vmatpush1.bf16.msra.mxu0 %v285_v23 }
  0x26   :  { %207 = vmatprep.subr.bf16.mxu0 %v289_v5 }
  0x29   :  { %208 = vmatpush1.bf16.msra.mxu0 %v286_v24 }
  0x2a   :  { %209 = vmatprep.subr.bf16.mxu0 %v289_v5 }
  0x2d   :  { %210 = vmatpush1.bf16.msra.mxu0 %v287_v25 }
  0x2e   :  { %211 = vmatprep.subr.bf16.mxu0 %v289_v5 }
  0x31   :  { %212 = vmatpush1.bf16.msra.mxu0 %v288_v26 }
  0x34   :  { %222 = vmatmul.mubr.bf16.vlgmr.msra.gmra.mrb[0].mxu0 %v246_v27 }
 0x107   :  { %v223_v29 = vpop.f32.mrb[0].mxu0 }
 0x108   :  { %v225_v30 = vpop.f32.mrb[1].mxu0  ;;  %v224_v32 = vadd.f32 %v245_v28, %v223_v29 }
 0x109   :  { %v226_v31 = vpop.f32.mrb[2].mxu0 }
 0x10a   :  { %v227_v33 = vadd.f32 %v245_v28, %v226_v31  ;;  %v228_v34 = vpop.f32.mrb[3].mxu0 }
 0x10c   :  { %v273_v35 = vpack.c.bf16 %v227_v33, %v224_v32 }
 0x10e   :  { %274 = vst [vmem:[%s371_s4] sm:$0xff] %v273_v35  }

</bundles_post_ra>
